<compile_context>
chip_gen: v5e
topology: v5e:2x2
jax: 0.10.0
libtpu: 0.0.40
codegen_flags: <defaults>
</compile_context>

<pallas_src>
import functools
import math

import jax
import jax.numpy as jnp
from jax.experimental import pallas as pl
from jax.experimental.pallas import tpu as pltpu


# ---------------------------------------------------------------------------
# Kernels
# ---------------------------------------------------------------------------
def _max_pool_kernel(x_ref, o_ref, *, num_anchors):
    """default path: max over the anchor axis, unrolled over static anchor slices."""
    c = x_ref.shape[1] // num_anchors
    m = x_ref[:, 0:c]
    for a in range(1, num_anchors):
        m = jnp.maximum(m, x_ref[:, a * c:(a + 1) * c])
    o_ref[...] = m


def _att_pool_kernel(x_ref, w1t_ref, b1_ref, w2_ref, b2_ref, *o_refs,
                     num_anchors, dual_feature):
    """att_pooling path: per-anchor MLP attention -> softmax over anchors -> weighted sum."""
    c = x_ref.shape[1] // num_anchors

    w1t = w1t_ref[...]            # (C, C)   (already transposed: in x out)
    b1 = b1_ref[...]              # (1, C)
    w2 = w2_ref[...]              # (1, C)
    b2 = b2_ref[...]              # (1, 1)

    # Attention logits per anchor: relu(x_a @ W1^T + b1) @ W2^T + b2  -> (tile_n, 1)
    logits = []
    for a in range(num_anchors):
        xa = x_ref[:, a * c:(a + 1) * c].astype(jnp.float32)
        h = jnp.dot(xa, w1t,
                    preferred_element_type=jnp.float32,
                    precision=jax.lax.Precision.HIGHEST) + b1
        h = jnp.maximum(h, 0.0)
        logits.append(jnp.sum(h * w2, axis=-1, keepdims=True) + b2)

    # Softmax over the anchor axis, kept as A separate (tile_n, 1) columns (VPU only).
    m = logits[0]
    for a in range(1, num_anchors):
        m = jnp.maximum(m, logits[a])
    exps = [jnp.exp(l - m) for l in logits]
    denom = exps[0]
    for a in range(1, num_anchors):
        denom = denom + exps[a]
    inv = 1.0 / denom

    # Weighted sum over anchors, unrolled (keeps only (tile_n, C) live values).
    acc = (exps[0] * inv) * x_ref[:, 0:c].astype(jnp.float32)
    for a in range(1, num_anchors):
        acc = acc + (exps[a] * inv) * x_ref[:, a * c:(a + 1) * c].astype(jnp.float32)

    if dual_feature:
        o_max_ref, o_fuse_ref = o_refs
        mx = x_ref[:, 0:c]
        for a in range(1, num_anchors):
            mx = jnp.maximum(mx, x_ref[:, a * c:(a + 1) * c])
        o_max_ref[...] = mx
    else:
        (o_fuse_ref,) = o_refs
    o_fuse_ref[...] = acc.astype(o_fuse_ref.dtype)


# ---------------------------------------------------------------------------
# Wrapper
# ---------------------------------------------------------------------------
_VMEM_LIMIT_BYTES = 48 * 1024 * 1024     # explicit scoped-VMEM request (fits v7x 64 MiB)
_X_BLOCK_BUDGET = 8 * 1024 * 1024        # single-buffer x block target (~16 MiB double-buffered)


def _choose_tile_n(n, a, c, itemsize, budget=_X_BLOCK_BUDGET):
    """Pick the point-tile so one x block is ~budget bytes, multiple of 8 rows."""
    per_row = max(a * c * itemsize, 1)
    tile = budget // per_row
    tile = max(8, min(tile, 4096))
    n_pad8 = ((n + 7) // 8) * 8
    tile = min(tile, n_pad8)
    return max(8, (tile // 8) * 8)


def inv_out_block_epn(x, att_params=None, *, att_pooling=False, dual_feature=False):
    """Pallas implementation of InvOutBlockEPN.forward (att_permute not supported)."""
    N, A, C = x.shape
    itemsize = jnp.dtype(x.dtype).itemsize
    tile_n = _choose_tile_n(N, A, C, itemsize)
    n_pad = pl.cdiv(N, tile_n) * tile_n

    # Flatten anchors into the lane axis: each grid step streams one big
    # (tile_n, A*C) lane-dense block; per-anchor slices are static lane slices.
    x2d = x.reshape(N, A * C)
    if n_pad != N:
        x2d = jnp.pad(x2d, ((0, n_pad - N), (0, 0)))

    grid = (n_pad // tile_n,)
    cparams = pltpu.CompilerParams(
        dimension_semantics=("parallel",),
        vmem_limit_bytes=_VMEM_LIMIT_BYTES,
    )
    x_spec = pl.BlockSpec((tile_n, A * C), lambda i: (i, 0))
    out_spec = pl.BlockSpec((tile_n, C), lambda i: (i, 0))

    if not att_pooling:
        out = pl.pallas_call(
            functools.partial(_max_pool_kernel, num_anchors=A),
            out_shape=jax.ShapeDtypeStruct((n_pad, C), x.dtype),
            grid_spec=pltpu.PrefetchScalarGridSpec(
                num_scalar_prefetch=0,
                grid=grid,
                in_specs=[x_spec],
                out_specs=out_spec,
            ),
            compiler_params=cparams,
        )(x2d)
        return out[:N]

    # ---- att_pooling path -------------------------------------------------
    w1, b1, w2, b2 = att_params
    w1t = jnp.asarray(w1, jnp.float32).T           # (C, C): y = x @ W1.T -> x @ w1t
    b1_2d = jnp.asarray(b1, jnp.float32).reshape(1, C)
    w2_2d = jnp.asarray(w2, jnp.float32).reshape(1, C)
    b2_2d = jnp.asarray(b2, jnp.float32).reshape(1, 1)

    const_specs = [
        pl.BlockSpec((C, C), lambda i: (0, 0)),    # W1^T (resident across grid)
        pl.BlockSpec((1, C), lambda i: (0, 0)),    # b1
        pl.BlockSpec((1, C), lambda i: (0, 0)),    # W2 row
        pl.BlockSpec((1, 1), lambda i: (0, 0)),    # b2
    ]

    if dual_feature:
        out_shape = (jax.ShapeDtypeStruct((n_pad, C), x.dtype),
                     jax.ShapeDtypeStruct((n_pad, C), x.dtype))
        out_specs = (out_spec, out_spec)
    else:
        out_shape = jax.ShapeDtypeStruct((n_pad, C), x.dtype)
        out_specs = out_spec

    res = pl.pallas_call(
        functools.partial(_att_pool_kernel, num_anchors=A, dual_feature=dual_feature),
        out_shape=out_shape,
        grid_spec=pltpu.PrefetchScalarGridSpec(
            num_scalar_prefetch=0,
            grid=grid,
            in_specs=[x_spec] + const_specs,
            out_specs=out_specs,
        ),
        compiler_params=cparams,
    )(x2d, w1t, b1_2d, w2_2d, b2_2d)

    if dual_feature:
        x_max, x_fusion = res
        return x_max[:N], x_fusion[:N]
    return res[:N]


# ---------------------------------------------------------------------------
# Reference (plain JAX) for verification
# ---------------------------------------------------------------------------
def _reference(x, att_params=None, att_pooling=False, dual_feature=False):
    if att_pooling:
        w1, b1, w2, b2 = att_params
        h = jnp.maximum(
            jnp.einsum('nac,dc->nad', x, w1, precision='highest') + b1, 0.0)
        att = jnp.einsum('nac,oc->nao', h, w2, precision='highest') + b2
        att_w = jax.nn.softmax(att, axis=1)
        fusion = jnp.sum(x * att_w, axis=1)
        if dual_feature:
            return jnp.max(x, axis=1), fusion
        return fusion
    return jnp.max(x, axis=1)


if __name__ == "__main__":
    key = jax.random.PRNGKey(0)
    k1, k2, k3, k4, k5 = jax.random.split(key, 5)

    # npoints (deliberately NOT a multiple of the tile), kanchor, in_dim
    N, A, C = 500, 4, 128
    x = jax.random.normal(k1, (N, A, C), dtype=jnp.float32)

    # attention_layer parameters: Linear(C, C) -> ReLU -> Linear(C, 1)
    lim = 1.0 / math.sqrt(C)
    w1 = jax.random.uniform(k2, (C, C), minval=-lim, maxval=lim, dtype=jnp.float32)
    b1 = jax.random.uniform(k3, (C,), minval=-lim, maxval=lim, dtype=jnp.float32)
    w2 = jax.random.uniform(k4, (1, C), minval=-lim, maxval=lim, dtype=jnp.float32)
    b2 = jax.random.uniform(k5, (1,), minval=-lim, maxval=lim, dtype=jnp.float32)
    params = (w1, b1, w2, b2)

    # Path 1: default -> max over anchors.
    out_max = jax.block_until_ready(inv_out_block_epn(x))
    ref_max = _reference(x)
    assert jnp.allclose(out_max, ref_max, atol=1e-5, rtol=1e-5), "max path mismatch"

    # Path 2: att_pooling -> attention-weighted fusion.
    out_fuse = jax.block_until_ready(inv_out_block_epn(x, params, att_pooling=True))
    ref_fuse = _reference(x, params, att_pooling=True)
    assert jnp.allclose(out_fuse, ref_fuse, atol=1e-4, rtol=1e-4), "att_pooling mismatch"

    # Path 3: att_pooling + dual_feature -> (max, fusion).
    out_d_max, out_d_fuse = inv_out_block_epn(x, params, att_pooling=True,
                                              dual_feature=True)
    out_d_max = jax.block_until_ready(out_d_max)
    out_d_fuse = jax.block_until_ready(out_d_fuse)
    ref_d_max, ref_d_fuse = _reference(x, params, att_pooling=True, dual_feature=True)
    assert jnp.allclose(out_d_max, ref_d_max, atol=1e-5, rtol=1e-5), "dual max mismatch"
    assert jnp.allclose(out_d_fuse, ref_d_fuse, atol=1e-4, rtol=1e-4), "dual fusion mismatch"

    print("KERNEL_OK")
</pallas_src>

<mosaic_0001>
module attributes {stable_mosaic.version = 11 : i64} {
  func.func @_max_pool_kernel(%arg0: i32, %arg1: memref<504x512xf32, #tpu.memory_space<vmem>>, %arg2: memref<504x128xf32, #tpu.memory_space<vmem>>) attributes {dimension_semantics = [#tpu.dimension_semantics<parallel>], iteration_bounds = array<i64: 1>, scalar_prefetch = 0 : i64, scratch_operands = 0 : i64, tpu.core_type = #tpu.core_type<tc>, window_params = [{transform_indices = @transform_0, window_bounds = array<i64: 504, 512>}, {transform_indices = @transform_1, window_bounds = array<i64: 504, 128>}]} {
    %c0 = arith.constant 0 : index
    %c0_0 = arith.constant 0 : index
    %0 = vector.load %arg1[%c0, %c0_0] : memref<504x512xf32, #tpu.memory_space<vmem>>, vector<504x128xf32>
    %c0_1 = arith.constant 0 : index
    %c128 = arith.constant 128 : index
    %1 = vector.load %arg1[%c0_1, %c128] : memref<504x512xf32, #tpu.memory_space<vmem>>, vector<504x128xf32>
    %2 = arith.maximumf %0, %1 : vector<504x128xf32>
    %c0_2 = arith.constant 0 : index
    %c256 = arith.constant 256 : index
    %3 = vector.load %arg1[%c0_2, %c256] : memref<504x512xf32, #tpu.memory_space<vmem>>, vector<504x128xf32>
    %4 = arith.maximumf %2, %3 : vector<504x128xf32>
    %c0_3 = arith.constant 0 : index
    %c384 = arith.constant 384 : index
    %5 = vector.load %arg1[%c0_3, %c384] : memref<504x512xf32, #tpu.memory_space<vmem>>, vector<504x128xf32>
    %6 = arith.maximumf %4, %5 : vector<504x128xf32>
    %c0_4 = arith.constant 0 : index
    %c0_5 = arith.constant 0 : index
    %7 = vector.load %arg2[%c0_4, %c0_5] : memref<504x128xf32, #tpu.memory_space<vmem>>, vector<504x128xf32>
    tpu.vector_store %arg2[%c0_4, %c0_5], %6 {strides = array<i32>} : memref<504x128xf32, #tpu.memory_space<vmem>>, vector<504x128xf32>,
    return
  }
  func.func @transform_0(%arg0: i32) -> (i32, i32) {
    %c0_i32 = arith.constant 0 : i32
    %c0_i32_0 = arith.constant 0 : i32
    return %arg0, %c0_i32 : i32, i32
  }
  func.func @transform_1(%arg0: i32) -> (i32, i32) {
    %c0_i32 = arith.constant 0 : i32
    %c0_i32_0 = arith.constant 0 : i32
    return %arg0, %c0_i32 : i32, i32
  }
}

</mosaic_0001>

<bundles_post_ra>
// kernel: tpu_custom_call.1
= control target key start
LH: loop header
LB: loop body
LE: loop exit
PB: predicated region body
PF: predicated region fallthrough
CT: control target
= control target key end

     0   :  { %6 = vsyncpa [#allocation3], 0  ;;  %s628_s0 = inlined_call_operand.hbm [shape: f32[504,512], index: 0, kind: input, shape index: {}]   ;;  %s629_s1 = inlined_call_operand.hbm [shape: f32[504,128], index: 1, kind: output, shape index: {}]  }
   0x1   :  { %7 = vsyncpa [#allocation4], 0  ;;  %s12_s8 = sshll.u32 %s628_s0, 4  ;;  %s606_s9 = smov [#allocation2]   ;;  %s13_s8 = int_to_ptr.hbm [resolvable:$true] %s12_s8 }
   0x2   :  { %s14_s10 = sshll.u32 %s606_s9, 4  ;;  %s607_s11 = smov 512   ;;  %s15_s10 = int_to_ptr.vmem [resolvable:$true] %s14_s10 }
   0x3   :  { %s608_s12 = smov 32  }
   0x4   :  { %20 = dma.hbm_to_vmem [thread:$0]  %s13_s8, 32256, %s15_s10, [#allocation3], %s607_s11, %s607_s11, %s608_s12  }
   0x5   :  { %602 = dma.done.wait [#allocation3], 32256  }
   0x6   :  { %603 = vsyncadd [#allocation3], 4294935040  ;;  %v25_v0 = vld [vmem:[#allocation2] sm:$0xff]  ;;  %v88_v1 = vld [vmem:[#allocation2 + $0x8] sm:$0xff]  ;;  %s609_s0 = smov [#allocation5]   ;;  %s535_s16 = sshll.u32 %s629_s1, 4  ;;  %s536_s16 = int_to_ptr.hbm [resolvable:$true] %s535_s16 }
   0x7   :  { %v214_v2 = vld [vmem:[#allocation2 + $0x10] sm:$0xff]  ;;  %v151_v3 = vmax.f32 %v25_v0, %v88_v1  ;;  %v26_v4 = vld [vmem:[#allocation2 + $0x20] sm:$0xff]  ;;  %v89_v5 = vld [vmem:[#allocation2 + $0x28] sm:$0xff]  ;;  %s533_s13 = sshll.u32 %s609_s0, 4  ;;  %s610_s17 = smov 128   ;;  %s534_s13 = int_to_ptr.vmem [resolvable:$true] %s533_s13 }
   0x8   :  { %v340_v6 = vld [vmem:[#allocation2 + $0x18] sm:$0xff]  ;;  %v152_v7 = vmax.f32 %v26_v4, %v89_v5  ;;  %v215_v8 = vld [vmem:[#allocation2 + $0x30] sm:$0xff]  ;;  %v27_v9 = vld [vmem:[#allocation2 + $0x40] sm:$0xff]  ;;  %s611_s18 = smov 8  }
   0x9   :  { %v277_v10 = vmax.f32 %v151_v3, %v214_v2  ;;  %v341_v11 = vld [vmem:[#allocation2 + $0x38] sm:$0xff]  ;;  %v90_v12 = vld [vmem:[#allocation2 + $0x48] sm:$0xff]  ;;  %v216_v13 = vld [vmem:[#allocation2 + $0x50] sm:$0xff] }
   0xa   :  { %v278_v14 = vmax.f32 %v152_v7, %v215_v8  ;;  %v153_v15 = vmax.f32 %v27_v9, %v90_v12  ;;  %v28_v16 = vld [vmem:[#allocation2 + $0x60] sm:$0xff]  ;;  %v91_v17 = vld [vmem:[#allocation2 + $0x68] sm:$0xff]  ;;  %v217_v18 = vld [vmem:[#allocation2 + $0x70] sm:$0xff] }
   0xb   :  { %v403_v19 = vmax.f32 %v277_v10, %v340_v6  ;;  %v342_v20 = vld [vmem:[#allocation2 + $0x58] sm:$0xff]  ;;  %v154_v21 = vmax.f32 %v28_v16, %v91_v17  ;;  %v29_v22 = vld [vmem:[#allocation2 + $0x80] sm:$0xff]  ;;  %v92_v23 = vld [vmem:[#allocation2 + $0x88] sm:$0xff] }
   0xc   :  { %v404_v24 = vmax.f32 %v278_v14, %v341_v11  ;;  %v279_v25 = vmax.f32 %v153_v15, %v216_v13  ;;  %v343_v26 = vld [vmem:[#allocation2 + $0x78] sm:$0xff]  ;;  %v155_v27 = vmax.f32 %v29_v22, %v92_v23  ;;  %v218_v28 = vld [vmem:[#allocation2 + $0x90] sm:$0xff]  ;;  %v30_v29 = vld [vmem:[#allocation2 + $0xa0] sm:$0xff] }
   0xd   :  { %466 = vst [vmem:[#allocation5] sm:$0xff] %v403_v19  ;;  %v280_v30 = vmax.f32 %v154_v21, %v217_v18  ;;  %v344_v31 = vld [vmem:[#allocation2 + $0x98] sm:$0xff]  ;;  %v93_v32 = vld [vmem:[#allocation2 + $0xa8] sm:$0xff]  ;;  %v219_v33 = vld [vmem:[#allocation2 + $0xb0] sm:$0xff] }
   0xe   :  { %467 = vst [vmem:[#allocation5 + $0x8] sm:$0xff] %v404_v24  ;;  %v405_v34 = vmax.f32 %v279_v25, %v342_v20  ;;  %v281_v35 = vmax.f32 %v155_v27, %v218_v28  ;;  %v156_v36 = vmax.f32 %v30_v29, %v93_v32  ;;  %v31_v37 = vld [vmem:[#allocation2 + $0xc0] sm:$0xff]  ;;  %v94_v38 = vld [vmem:[#allocation2 + $0xc8] sm:$0xff]  ;;  %v220_v39 = vld [vmem:[#allocation2 + $0xd0] sm:$0xff] }
   0xf   :  { %v406_v40 = vmax.f32 %v280_v30, %v343_v26  ;;  %v345_v41 = vld [vmem:[#allocation2 + $0xb8] sm:$0xff]  ;;  %v157_v42 = vmax.f32 %v31_v37, %v94_v38  ;;  %v32_v43 = vld [vmem:[#allocation2 + $0xe0] sm:$0xff]  ;;  %v95_v44 = vld [vmem:[#allocation2 + $0xe8] sm:$0xff] }
  0x10   :  { %468 = vst [vmem:[#allocation5 + $0x10] sm:$0xff] %v405_v34  ;;  %v407_v45 = vmax.f32 %v281_v35, %v344_v31  ;;  %v282_v46 = vmax.f32 %v156_v36, %v219_v33  ;;  %v346_v47 = vld [vmem:[#allocation2 + $0xd8] sm:$0xff]  ;;  %v158_v48 = vmax.f32 %v32_v43, %v95_v44  ;;  %v221_v49 = vld [vmem:[#allocation2 + $0xf0] sm:$0xff]  ;;  %v33_v50 = vld [vmem:[#allocation2 + $0x100] sm:$0xff] }
  0x11   :  { %469 = vst [vmem:[#allocation5 + $0x18] sm:$0xff] %v406_v40  ;;  %v283_v51 = vmax.f32 %v157_v42, %v220_v39  ;;  %v347_v52 = vld [vmem:[#allocation2 + $0xf8] sm:$0xff]  ;;  %v96_v53 = vld [vmem:[#allocation2 + $0x108] sm:$0xff]  ;;  %v222_v54 = vld [vmem:[#allocation2 + $0x110] sm:$0xff] }
  0x12   :  { %470 = vst [vmem:[#allocation5 + $0x20] sm:$0xff] %v407_v45  ;;  %v408_v55 = vmax.f32 %v282_v46, %v345_v41  ;;  %v284_v56 = vmax.f32 %v158_v48, %v221_v49  ;;  %v159_v57 = vmax.f32 %v33_v50, %v96_v53  ;;  %v34_v58 = vld [vmem:[#allocation2 + $0x120] sm:$0xff]  ;;  %v97_v59 = vld [vmem:[#allocation2 + $0x128] sm:$0xff]  ;;  %v223_v60 = vld [vmem:[#allocation2 + $0x130] sm:$0xff] }
  0x13   :  { %v409_v61 = vmax.f32 %v283_v51, %v346_v47  ;;  %v348_v62 = vld [vmem:[#allocation2 + $0x118] sm:$0xff]  ;;  %v160_v63 = vmax.f32 %v34_v58, %v97_v59  ;;  %v35_v0 = vld [vmem:[#allocation2 + $0x140] sm:$0xff]  ;;  %v98_v1 = vld [vmem:[#allocation2 + $0x148] sm:$0xff] }
  0x14   :  { %471 = vst [vmem:[#allocation5 + $0x28] sm:$0xff] %v408_v55  ;;  %v410_v2 = vmax.f32 %v284_v56, %v347_v52  ;;  %v285_v3 = vmax.f32 %v159_v57, %v222_v54  ;;  %v349_v4 = vld [vmem:[#allocation2 + $0x138] sm:$0xff]  ;;  %v161_v5 = vmax.f32 %v35_v0, %v98_v1  ;;  %v224_v6 = vld [vmem:[#allocation2 + $0x150] sm:$0xff]  ;;  %v36_v7 = vld [vmem:[#allocation2 + $0x160] sm:$0xff] }
  0x15   :  { %472 = vst [vmem:[#allocation5 + $0x30] sm:$0xff] %v409_v61  ;;  %v286_v8 = vmax.f32 %v160_v63, %v223_v60  ;;  %v350_v9 = vld [vmem:[#allocation2 + $0x158] sm:$0xff]  ;;  %v99_v10 = vld [vmem:[#allocation2 + $0x168] sm:$0xff]  ;;  %v225_v11 = vld [vmem:[#allocation2 + $0x170] sm:$0xff] }
  0x16   :  { %473 = vst [vmem:[#allocation5 + $0x38] sm:$0xff] %v410_v2  ;;  %v411_v12 = vmax.f32 %v285_v3, %v348_v62  ;;  %v287_v13 = vmax.f32 %v161_v5, %v224_v6  ;;  %v162_v14 = vmax.f32 %v36_v7, %v99_v10  ;;  %v37_v15 = vld [vmem:[#allocation2 + $0x180] sm:$0xff]  ;;  %v100_v16 = vld [vmem:[#allocation2 + $0x188] sm:$0xff]  ;;  %v226_v17 = vld [vmem:[#allocation2 + $0x190] sm:$0xff] }
  0x17   :  { %v412_v18 = vmax.f32 %v286_v8, %v349_v4  ;;  %v351_v19 = vld [vmem:[#allocation2 + $0x178] sm:$0xff]  ;;  %v163_v20 = vmax.f32 %v37_v15, %v100_v16  ;;  %v38_v21 = vld [vmem:[#allocation2 + $0x1a0] sm:$0xff]  ;;  %v101_v22 = vld [vmem:[#allocation2 + $0x1a8] sm:$0xff] }
  0x18   :  { %474 = vst [vmem:[#allocation5 + $0x40] sm:$0xff] %v411_v12  ;;  %v413_v23 = vmax.f32 %v287_v13, %v350_v9  ;;  %v288_v24 = vmax.f32 %v162_v14, %v225_v11  ;;  %v352_v25 = vld [vmem:[#allocation2 + $0x198] sm:$0xff]  ;;  %v164_v26 = vmax.f32 %v38_v21, %v101_v22  ;;  %v227_v27 = vld [vmem:[#allocation2 + $0x1b0] sm:$0xff]  ;;  %v39_v28 = vld [vmem:[#allocation2 + $0x1c0] sm:$0xff] }
  0x19   :  { %475 = vst [vmem:[#allocation5 + $0x48] sm:$0xff] %v412_v18  ;;  %v289_v29 = vmax.f32 %v163_v20, %v226_v17  ;;  %v353_v30 = vld [vmem:[#allocation2 + $0x1b8] sm:$0xff]  ;;  %v102_v31 = vld [vmem:[#allocation2 + $0x1c8] sm:$0xff]  ;;  %v228_v32 = vld [vmem:[#allocation2 + $0x1d0] sm:$0xff] }
  0x1a   :  { %476 = vst [vmem:[#allocation5 + $0x50] sm:$0xff] %v413_v23  ;;  %v414_v33 = vmax.f32 %v288_v24, %v351_v19  ;;  %v290_v34 = vmax.f32 %v164_v26, %v227_v27  ;;  %v165_v35 = vmax.f32 %v39_v28, %v102_v31  ;;  %v40_v36 = vld [vmem:[#allocation2 + $0x1e0] sm:$0xff]  ;;  %v103_v37 = vld [vmem:[#allocation2 + $0x1e8] sm:$0xff]  ;;  %v229_v38 = vld [vmem:[#allocation2 + $0x1f0] sm:$0xff] }
  0x1b   :  { %v415_v39 = vmax.f32 %v289_v29, %v352_v25  ;;  %v354_v40 = vld [vmem:[#allocation2 + $0x1d8] sm:$0xff]  ;;  %v166_v41 = vmax.f32 %v40_v36, %v103_v37  ;;  %v41_v42 = vld [vmem:[#allocation2 + $0x200] sm:$0xff]  ;;  %v104_v43 = vld [vmem:[#allocation2 + $0x208] sm:$0xff] }
  0x1c   :  { %477 = vst [vmem:[#allocation5 + $0x58] sm:$0xff] %v414_v33  ;;  %v416_v44 = vmax.f32 %v290_v34, %v353_v30  ;;  %v291_v45 = vmax.f32 %v165_v35, %v228_v32  ;;  %v355_v46 = vld [vmem:[#allocation2 + $0x1f8] sm:$0xff]  ;;  %v167_v47 = vmax.f32 %v41_v42, %v104_v43  ;;  %v230_v48 = vld [vmem:[#allocation2 + $0x210] sm:$0xff]  ;;  %v42_v49 = vld [vmem:[#allocation2 + $0x220] sm:$0xff] }
  0x1d   :  { %478 = vst [vmem:[#allocation5 + $0x60] sm:$0xff] %v415_v39  ;;  %v292_v50 = vmax.f32 %v166_v41, %v229_v38  ;;  %v356_v51 = vld [vmem:[#allocation2 + $0x218] sm:$0xff]  ;;  %v105_v52 = vld [vmem:[#allocation2 + $0x228] sm:$0xff]  ;;  %v231_v53 = vld [vmem:[#allocation2 + $0x230] sm:$0xff] }
  0x1e   :  { %479 = vst [vmem:[#allocation5 + $0x68] sm:$0xff] %v416_v44  ;;  %v417_v54 = vmax.f32 %v291_v45, %v354_v40  ;;  %v293_v55 = vmax.f32 %v167_v47, %v230_v48  ;;  %v168_v56 = vmax.f32 %v42_v49, %v105_v52  ;;  %v43_v57 = vld [vmem:[#allocation2 + $0x240] sm:$0xff]  ;;  %v106_v58 = vld [vmem:[#allocation2 + $0x248] sm:$0xff]  ;;  %v232_v59 = vld [vmem:[#allocation2 + $0x250] sm:$0xff] }
  0x1f   :  { %v418_v60 = vmax.f32 %v292_v50, %v355_v46  ;;  %v357_v61 = vld [vmem:[#allocation2 + $0x238] sm:$0xff]  ;;  %v169_v62 = vmax.f32 %v43_v57, %v106_v58  ;;  %v44_v63 = vld [vmem:[#allocation2 + $0x260] sm:$0xff]  ;;  %v107_v0 = vld [vmem:[#allocation2 + $0x268] sm:$0xff] }
  0x20   :  { %480 = vst [vmem:[#allocation5 + $0x70] sm:$0xff] %v417_v54  ;;  %v419_v1 = vmax.f32 %v293_v55, %v356_v51  ;;  %v294_v2 = vmax.f32 %v168_v56, %v231_v53  ;;  %v358_v3 = vld [vmem:[#allocation2 + $0x258] sm:$0xff]  ;;  %v170_v4 = vmax.f32 %v44_v63, %v107_v0  ;;  %v233_v5 = vld [vmem:[#allocation2 + $0x270] sm:$0xff]  ;;  %v45_v6 = vld [vmem:[#allocation2 + $0x280] sm:$0xff] }
  0x21   :  { %481 = vst [vmem:[#allocation5 + $0x78] sm:$0xff] %v418_v60  ;;  %v295_v7 = vmax.f32 %v169_v62, %v232_v59  ;;  %v359_v8 = vld [vmem:[#allocation2 + $0x278] sm:$0xff]  ;;  %v108_v9 = vld [vmem:[#allocation2 + $0x288] sm:$0xff]  ;;  %v234_v10 = vld [vmem:[#allocation2 + $0x290] sm:$0xff] }
  0x22   :  { %482 = vst [vmem:[#allocation5 + $0x80] sm:$0xff] %v419_v1  ;;  %v420_v11 = vmax.f32 %v294_v2, %v357_v61  ;;  %v296_v12 = vmax.f32 %v170_v4, %v233_v5  ;;  %v171_v13 = vmax.f32 %v45_v6, %v108_v9  ;;  %v46_v14 = vld [vmem:[#allocation2 + $0x2a0] sm:$0xff]  ;;  %v109_v15 = vld [vmem:[#allocation2 + $0x2a8] sm:$0xff]  ;;  %v235_v16 = vld [vmem:[#allocation2 + $0x2b0] sm:$0xff] }
  0x23   :  { %v421_v17 = vmax.f32 %v295_v7, %v358_v3  ;;  %v360_v18 = vld [vmem:[#allocation2 + $0x298] sm:$0xff]  ;;  %v172_v19 = vmax.f32 %v46_v14, %v109_v15  ;;  %v47_v20 = vld [vmem:[#allocation2 + $0x2c0] sm:$0xff]  ;;  %v110_v21 = vld [vmem:[#allocation2 + $0x2c8] sm:$0xff] }
  0x24   :  { %483 = vst [vmem:[#allocation5 + $0x88] sm:$0xff] %v420_v11  ;;  %v422_v22 = vmax.f32 %v296_v12, %v359_v8  ;;  %v297_v23 = vmax.f32 %v171_v13, %v234_v10  ;;  %v361_v24 = vld [vmem:[#allocation2 + $0x2b8] sm:$0xff]  ;;  %v173_v25 = vmax.f32 %v47_v20, %v110_v21  ;;  %v236_v26 = vld [vmem:[#allocation2 + $0x2d0] sm:$0xff]  ;;  %v48_v27 = vld [vmem:[#allocation2 + $0x2e0] sm:$0xff] }
  0x25   :  { %484 = vst [vmem:[#allocation5 + $0x90] sm:$0xff] %v421_v17  ;;  %v298_v28 = vmax.f32 %v172_v19, %v235_v16  ;;  %v362_v29 = vld [vmem:[#allocation2 + $0x2d8] sm:$0xff]  ;;  %v111_v30 = vld [vmem:[#allocation2 + $0x2e8] sm:$0xff]  ;;  %v237_v31 = vld [vmem:[#allocation2 + $0x2f0] sm:$0xff] }
  0x26   :  { %485 = vst [vmem:[#allocation5 + $0x98] sm:$0xff] %v422_v22  ;;  %v423_v32 = vmax.f32 %v297_v23, %v360_v18  ;;  %v299_v33 = vmax.f32 %v173_v25, %v236_v26  ;;  %v174_v34 = vmax.f32 %v48_v27, %v111_v30  ;;  %v49_v35 = vld [vmem:[#allocation2 + $0x300] sm:$0xff]  ;;  %v112_v36 = vld [vmem:[#allocation2 + $0x308] sm:$0xff]  ;;  %v238_v37 = vld [vmem:[#allocation2 + $0x310] sm:$0xff] }
  0x27   :  { %v424_v38 = vmax.f32 %v298_v28, %v361_v24  ;;  %v363_v39 = vld [vmem:[#allocation2 + $0x2f8] sm:$0xff]  ;;  %v175_v40 = vmax.f32 %v49_v35, %v112_v36  ;;  %v50_v41 = vld [vmem:[#allocation2 + $0x320] sm:$0xff]  ;;  %v113_v42 = vld [vmem:[#allocation2 + $0x328] sm:$0xff] }
  0x28   :  { %486 = vst [vmem:[#allocation5 + $0xa0] sm:$0xff] %v423_v32  ;;  %v425_v43 = vmax.f32 %v299_v33, %v362_v29  ;;  %v300_v44 = vmax.f32 %v174_v34, %v237_v31  ;;  %v364_v45 = vld [vmem:[#allocation2 + $0x318] sm:$0xff]  ;;  %v176_v46 = vmax.f32 %v50_v41, %v113_v42  ;;  %v239_v47 = vld [vmem:[#allocation2 + $0x330] sm:$0xff]  ;;  %v51_v48 = vld [vmem:[#allocation2 + $0x340] sm:$0xff] }
  0x29   :  { %487 = vst [vmem:[#allocation5 + $0xa8] sm:$0xff] %v424_v38  ;;  %v301_v49 = vmax.f32 %v175_v40, %v238_v37  ;;  %v365_v50 = vld [vmem:[#allocation2 + $0x338] sm:$0xff]  ;;  %v114_v51 = vld [vmem:[#allocation2 + $0x348] sm:$0xff]  ;;  %v240_v52 = vld [vmem:[#allocation2 + $0x350] sm:$0xff] }
  0x2a   :  { %488 = vst [vmem:[#allocation5 + $0xb0] sm:$0xff] %v425_v43  ;;  %v426_v53 = vmax.f32 %v300_v44, %v363_v39  ;;  %v302_v54 = vmax.f32 %v176_v46, %v239_v47  ;;  %v177_v55 = vmax.f32 %v51_v48, %v114_v51  ;;  %v52_v56 = vld [vmem:[#allocation2 + $0x360] sm:$0xff]  ;;  %v115_v57 = vld [vmem:[#allocation2 + $0x368] sm:$0xff]  ;;  %v241_v58 = vld [vmem:[#allocation2 + $0x370] sm:$0xff] }
  0x2b   :  { %v427_v59 = vmax.f32 %v301_v49, %v364_v45  ;;  %v366_v60 = vld [vmem:[#allocation2 + $0x358] sm:$0xff]  ;;  %v178_v61 = vmax.f32 %v52_v56, %v115_v57  ;;  %v53_v62 = vld [vmem:[#allocation2 + $0x380] sm:$0xff]  ;;  %v116_v63 = vld [vmem:[#allocation2 + $0x388] sm:$0xff] }
  0x2c   :  { %489 = vst [vmem:[#allocation5 + $0xb8] sm:$0xff] %v426_v53  ;;  %v428_v0 = vmax.f32 %v302_v54, %v365_v50  ;;  %v303_v1 = vmax.f32 %v177_v55, %v240_v52  ;;  %v367_v2 = vld [vmem:[#allocation2 + $0x378] sm:$0xff]  ;;  %v179_v3 = vmax.f32 %v53_v62, %v116_v63  ;;  %v242_v4 = vld [vmem:[#allocation2 + $0x390] sm:$0xff]  ;;  %v54_v5 = vld [vmem:[#allocation2 + $0x3a0] sm:$0xff] }
  0x2d   :  { %490 = vst [vmem:[#allocation5 + $0xc0] sm:$0xff] %v427_v59  ;;  %v304_v6 = vmax.f32 %v178_v61, %v241_v58  ;;  %v368_v7 = vld [vmem:[#allocation2 + $0x398] sm:$0xff]  ;;  %v117_v8 = vld [vmem:[#allocation2 + $0x3a8] sm:$0xff]  ;;  %v243_v9 = vld [vmem:[#allocation2 + $0x3b0] sm:$0xff] }
  0x2e   :  { %491 = vst [vmem:[#allocation5 + $0xc8] sm:$0xff] %v428_v0  ;;  %v429_v10 = vmax.f32 %v303_v1, %v366_v60  ;;  %v305_v11 = vmax.f32 %v179_v3, %v242_v4  ;;  %v180_v12 = vmax.f32 %v54_v5, %v117_v8  ;;  %v55_v13 = vld [vmem:[#allocation2 + $0x3c0] sm:$0xff]  ;;  %v118_v14 = vld [vmem:[#allocation2 + $0x3c8] sm:$0xff]  ;;  %v244_v15 = vld [vmem:[#allocation2 + $0x3d0] sm:$0xff] }
  0x2f   :  { %v430_v16 = vmax.f32 %v304_v6, %v367_v2  ;;  %v369_v17 = vld [vmem:[#allocation2 + $0x3b8] sm:$0xff]  ;;  %v181_v18 = vmax.f32 %v55_v13, %v118_v14  ;;  %v56_v19 = vld [vmem:[#allocation2 + $0x3e0] sm:$0xff]  ;;  %v119_v20 = vld [vmem:[#allocation2 + $0x3e8] sm:$0xff] }
  0x30   :  { %492 = vst [vmem:[#allocation5 + $0xd0] sm:$0xff] %v429_v10  ;;  %v431_v21 = vmax.f32 %v305_v11, %v368_v7  ;;  %v306_v22 = vmax.f32 %v180_v12, %v243_v9  ;;  %v370_v23 = vld [vmem:[#allocation2 + $0x3d8] sm:$0xff]  ;;  %v182_v24 = vmax.f32 %v56_v19, %v119_v20  ;;  %v245_v25 = vld [vmem:[#allocation2 + $0x3f0] sm:$0xff]  ;;  %v57_v26 = vld [vmem:[#allocation2 + $0x400] sm:$0xff] }
  0x31   :  { %493 = vst [vmem:[#allocation5 + $0xd8] sm:$0xff] %v430_v16  ;;  %v307_v27 = vmax.f32 %v181_v18, %v244_v15  ;;  %v371_v28 = vld [vmem:[#allocation2 + $0x3f8] sm:$0xff]  ;;  %v120_v29 = vld [vmem:[#allocation2 + $0x408] sm:$0xff]  ;;  %v246_v30 = vld [vmem:[#allocation2 + $0x410] sm:$0xff] }
  0x32   :  { %494 = vst [vmem:[#allocation5 + $0xe0] sm:$0xff] %v431_v21  ;;  %v432_v31 = vmax.f32 %v306_v22, %v369_v17  ;;  %v308_v32 = vmax.f32 %v182_v24, %v245_v25  ;;  %v183_v33 = vmax.f32 %v57_v26, %v120_v29  ;;  %v58_v34 = vld [vmem:[#allocation2 + $0x420] sm:$0xff]  ;;  %v121_v35 = vld [vmem:[#allocation2 + $0x428] sm:$0xff]  ;;  %v247_v36 = vld [vmem:[#allocation2 + $0x430] sm:$0xff] }
  0x33   :  { %v433_v37 = vmax.f32 %v307_v27, %v370_v23  ;;  %v372_v38 = vld [vmem:[#allocation2 + $0x418] sm:$0xff]  ;;  %v184_v39 = vmax.f32 %v58_v34, %v121_v35  ;;  %v59_v40 = vld [vmem:[#allocation2 + $0x440] sm:$0xff]  ;;  %v122_v41 = vld [vmem:[#allocation2 + $0x448] sm:$0xff] }
  0x34   :  { %495 = vst [vmem:[#allocation5 + $0xe8] sm:$0xff] %v432_v31  ;;  %v434_v42 = vmax.f32 %v308_v32, %v371_v28  ;;  %v309_v43 = vmax.f32 %v183_v33, %v246_v30  ;;  %v373_v44 = vld [vmem:[#allocation2 + $0x438] sm:$0xff]  ;;  %v185_v45 = vmax.f32 %v59_v40, %v122_v41  ;;  %v248_v46 = vld [vmem:[#allocation2 + $0x450] sm:$0xff]  ;;  %v60_v47 = vld [vmem:[#allocation2 + $0x460] sm:$0xff] }
  0x35   :  { %496 = vst [vmem:[#allocation5 + $0xf0] sm:$0xff] %v433_v37  ;;  %v310_v48 = vmax.f32 %v184_v39, %v247_v36  ;;  %v374_v49 = vld [vmem:[#allocation2 + $0x458] sm:$0xff]  ;;  %v123_v50 = vld [vmem:[#allocation2 + $0x468] sm:$0xff]  ;;  %v249_v51 = vld [vmem:[#allocation2 + $0x470] sm:$0xff] }
  0x36   :  { %497 = vst [vmem:[#allocation5 + $0xf8] sm:$0xff] %v434_v42  ;;  %v435_v52 = vmax.f32 %v309_v43, %v372_v38  ;;  %v311_v53 = vmax.f32 %v185_v45, %v248_v46  ;;  %v186_v54 = vmax.f32 %v60_v47, %v123_v50  ;;  %v61_v55 = vld [vmem:[#allocation2 + $0x480] sm:$0xff]  ;;  %v124_v56 = vld [vmem:[#allocation2 + $0x488] sm:$0xff]  ;;  %v250_v57 = vld [vmem:[#allocation2 + $0x490] sm:$0xff] }
  0x37   :  { %v436_v58 = vmax.f32 %v310_v48, %v373_v44  ;;  %v375_v59 = vld [vmem:[#allocation2 + $0x478] sm:$0xff]  ;;  %v187_v60 = vmax.f32 %v61_v55, %v124_v56  ;;  %v62_v61 = vld [vmem:[#allocation2 + $0x4a0] sm:$0xff]  ;;  %v125_v62 = vld [vmem:[#allocation2 + $0x4a8] sm:$0xff] }
  0x38   :  { %498 = vst [vmem:[#allocation5 + $0x100] sm:$0xff] %v435_v52  ;;  %v437_v63 = vmax.f32 %v311_v53, %v374_v49  ;;  %v312_v0 = vmax.f32 %v186_v54, %v249_v51  ;;  %v376_v1 = vld [vmem:[#allocation2 + $0x498] sm:$0xff]  ;;  %v188_v2 = vmax.f32 %v62_v61, %v125_v62  ;;  %v251_v3 = vld [vmem:[#allocation2 + $0x4b0] sm:$0xff]  ;;  %v63_v4 = vld [vmem:[#allocation2 + $0x4c0] sm:$0xff] }
  0x39   :  { %499 = vst [vmem:[#allocation5 + $0x108] sm:$0xff] %v436_v58  ;;  %v313_v5 = vmax.f32 %v187_v60, %v250_v57  ;;  %v377_v6 = vld [vmem:[#allocation2 + $0x4b8] sm:$0xff]  ;;  %v126_v7 = vld [vmem:[#allocation2 + $0x4c8] sm:$0xff]  ;;  %v252_v8 = vld [vmem:[#allocation2 + $0x4d0] sm:$0xff] }
  0x3a   :  { %500 = vst [vmem:[#allocation5 + $0x110] sm:$0xff] %v437_v63  ;;  %v438_v9 = vmax.f32 %v312_v0, %v375_v59  ;;  %v314_v10 = vmax.f32 %v188_v2, %v251_v3  ;;  %v189_v11 = vmax.f32 %v63_v4, %v126_v7  ;;  %v64_v12 = vld [vmem:[#allocation2 + $0x4e0] sm:$0xff]  ;;  %v127_v13 = vld [vmem:[#allocation2 + $0x4e8] sm:$0xff]  ;;  %v253_v14 = vld [vmem:[#allocation2 + $0x4f0] sm:$0xff] }
  0x3b   :  { %v439_v15 = vmax.f32 %v313_v5, %v376_v1  ;;  %v378_v16 = vld [vmem:[#allocation2 + $0x4d8] sm:$0xff]  ;;  %v190_v17 = vmax.f32 %v64_v12, %v127_v13  ;;  %v65_v18 = vld [vmem:[#allocation2 + $0x500] sm:$0xff]  ;;  %v128_v19 = vld [vmem:[#allocation2 + $0x508] sm:$0xff] }
  0x3c   :  { %501 = vst [vmem:[#allocation5 + $0x118] sm:$0xff] %v438_v9  ;;  %v440_v20 = vmax.f32 %v314_v10, %v377_v6  ;;  %v315_v21 = vmax.f32 %v189_v11, %v252_v8  ;;  %v379_v22 = vld [vmem:[#allocation2 + $0x4f8] sm:$0xff]  ;;  %v191_v23 = vmax.f32 %v65_v18, %v128_v19  ;;  %v254_v24 = vld [vmem:[#allocation2 + $0x510] sm:$0xff]  ;;  %v66_v25 = vld [vmem:[#allocation2 + $0x520] sm:$0xff] }
  0x3d   :  { %502 = vst [vmem:[#allocation5 + $0x120] sm:$0xff] %v439_v15  ;;  %v316_v26 = vmax.f32 %v190_v17, %v253_v14  ;;  %v380_v27 = vld [vmem:[#allocation2 + $0x518] sm:$0xff]  ;;  %v129_v28 = vld [vmem:[#allocation2 + $0x528] sm:$0xff]  ;;  %v255_v29 = vld [vmem:[#allocation2 + $0x530] sm:$0xff] }
  0x3e   :  { %503 = vst [vmem:[#allocation5 + $0x128] sm:$0xff] %v440_v20  ;;  %v441_v30 = vmax.f32 %v315_v21, %v378_v16  ;;  %v317_v31 = vmax.f32 %v191_v23, %v254_v24  ;;  %v192_v32 = vmax.f32 %v66_v25, %v129_v28  ;;  %v67_v33 = vld [vmem:[#allocation2 + $0x540] sm:$0xff]  ;;  %v130_v34 = vld [vmem:[#allocation2 + $0x548] sm:$0xff]  ;;  %v256_v35 = vld [vmem:[#allocation2 + $0x550] sm:$0xff] }
  0x3f   :  { %v442_v36 = vmax.f32 %v316_v26, %v379_v22  ;;  %v381_v37 = vld [vmem:[#allocation2 + $0x538] sm:$0xff]  ;;  %v193_v38 = vmax.f32 %v67_v33, %v130_v34  ;;  %v68_v39 = vld [vmem:[#allocation2 + $0x560] sm:$0xff]  ;;  %v131_v40 = vld [vmem:[#allocation2 + $0x568] sm:$0xff] }
  0x40   :  { %504 = vst [vmem:[#allocation5 + $0x130] sm:$0xff] %v441_v30  ;;  %v443_v41 = vmax.f32 %v317_v31, %v380_v27  ;;  %v318_v42 = vmax.f32 %v192_v32, %v255_v29  ;;  %v382_v43 = vld [vmem:[#allocation2 + $0x558] sm:$0xff]  ;;  %v194_v44 = vmax.f32 %v68_v39, %v131_v40  ;;  %v257_v45 = vld [vmem:[#allocation2 + $0x570] sm:$0xff]  ;;  %v69_v46 = vld [vmem:[#allocation2 + $0x580] sm:$0xff] }
  0x41   :  { %505 = vst [vmem:[#allocation5 + $0x138] sm:$0xff] %v442_v36  ;;  %v319_v47 = vmax.f32 %v193_v38, %v256_v35  ;;  %v383_v48 = vld [vmem:[#allocation2 + $0x578] sm:$0xff]  ;;  %v132_v49 = vld [vmem:[#allocation2 + $0x588] sm:$0xff]  ;;  %v258_v50 = vld [vmem:[#allocation2 + $0x590] sm:$0xff] }
  0x42   :  { %506 = vst [vmem:[#allocation5 + $0x140] sm:$0xff] %v443_v41  ;;  %v444_v51 = vmax.f32 %v318_v42, %v381_v37  ;;  %v320_v52 = vmax.f32 %v194_v44, %v257_v45  ;;  %v195_v53 = vmax.f32 %v69_v46, %v132_v49  ;;  %v70_v54 = vld [vmem:[#allocation2 + $0x5a0] sm:$0xff]  ;;  %v133_v55 = vld [vmem:[#allocation2 + $0x5a8] sm:$0xff]  ;;  %v259_v56 = vld [vmem:[#allocation2 + $0x5b0] sm:$0xff] }
  0x43   :  { %v445_v57 = vmax.f32 %v319_v47, %v382_v43  ;;  %v384_v58 = vld [vmem:[#allocation2 + $0x598] sm:$0xff]  ;;  %v196_v59 = vmax.f32 %v70_v54, %v133_v55  ;;  %v71_v60 = vld [vmem:[#allocation2 + $0x5c0] sm:$0xff]  ;;  %v134_v61 = vld [vmem:[#allocation2 + $0x5c8] sm:$0xff] }
  0x44   :  { %507 = vst [vmem:[#allocation5 + $0x148] sm:$0xff] %v444_v51  ;;  %v446_v62 = vmax.f32 %v320_v52, %v383_v48  ;;  %v321_v63 = vmax.f32 %v195_v53, %v258_v50  ;;  %v385_v0 = vld [vmem:[#allocation2 + $0x5b8] sm:$0xff]  ;;  %v197_v1 = vmax.f32 %v71_v60, %v134_v61  ;;  %v260_v2 = vld [vmem:[#allocation2 + $0x5d0] sm:$0xff]  ;;  %v72_v3 = vld [vmem:[#allocation2 + $0x5e0] sm:$0xff] }
  0x45   :  { %508 = vst [vmem:[#allocation5 + $0x150] sm:$0xff] %v445_v57  ;;  %v322_v4 = vmax.f32 %v196_v59, %v259_v56  ;;  %v386_v5 = vld [vmem:[#allocation2 + $0x5d8] sm:$0xff]  ;;  %v135_v6 = vld [vmem:[#allocation2 + $0x5e8] sm:$0xff]  ;;  %v261_v7 = vld [vmem:[#allocation2 + $0x5f0] sm:$0xff] }
  0x46   :  { %509 = vst [vmem:[#allocation5 + $0x158] sm:$0xff] %v446_v62  ;;  %v447_v8 = vmax.f32 %v321_v63, %v384_v58  ;;  %v323_v9 = vmax.f32 %v197_v1, %v260_v2  ;;  %v198_v10 = vmax.f32 %v72_v3, %v135_v6  ;;  %v73_v11 = vld [vmem:[#allocation2 + $0x600] sm:$0xff]  ;;  %v136_v12 = vld [vmem:[#allocation2 + $0x608] sm:$0xff]  ;;  %v262_v13 = vld [vmem:[#allocation2 + $0x610] sm:$0xff] }
  0x47   :  { %v448_v14 = vmax.f32 %v322_v4, %v385_v0  ;;  %v387_v15 = vld [vmem:[#allocation2 + $0x5f8] sm:$0xff]  ;;  %v199_v16 = vmax.f32 %v73_v11, %v136_v12  ;;  %v74_v17 = vld [vmem:[#allocation2 + $0x620] sm:$0xff]  ;;  %v137_v18 = vld [vmem:[#allocation2 + $0x628] sm:$0xff] }
  0x48   :  { %510 = vst [vmem:[#allocation5 + $0x160] sm:$0xff] %v447_v8  ;;  %v449_v19 = vmax.f32 %v323_v9, %v386_v5  ;;  %v324_v20 = vmax.f32 %v198_v10, %v261_v7  ;;  %v388_v21 = vld [vmem:[#allocation2 + $0x618] sm:$0xff]  ;;  %v200_v22 = vmax.f32 %v74_v17, %v137_v18  ;;  %v263_v23 = vld [vmem:[#allocation2 + $0x630] sm:$0xff]  ;;  %v75_v24 = vld [vmem:[#allocation2 + $0x640] sm:$0xff] }
  0x49   :  { %511 = vst [vmem:[#allocation5 + $0x168] sm:$0xff] %v448_v14  ;;  %v325_v25 = vmax.f32 %v199_v16, %v262_v13  ;;  %v389_v26 = vld [vmem:[#allocation2 + $0x638] sm:$0xff]  ;;  %v138_v27 = vld [vmem:[#allocation2 + $0x648] sm:$0xff]  ;;  %v264_v28 = vld [vmem:[#allocation2 + $0x650] sm:$0xff] }
  0x4a   :  { %512 = vst [vmem:[#allocation5 + $0x170] sm:$0xff] %v449_v19  ;;  %v450_v29 = vmax.f32 %v324_v20, %v387_v15  ;;  %v326_v30 = vmax.f32 %v200_v22, %v263_v23  ;;  %v201_v31 = vmax.f32 %v75_v24, %v138_v27  ;;  %v76_v32 = vld [vmem:[#allocation2 + $0x660] sm:$0xff]  ;;  %v139_v33 = vld [vmem:[#allocation2 + $0x668] sm:$0xff]  ;;  %v265_v34 = vld [vmem:[#allocation2 + $0x670] sm:$0xff] }
  0x4b   :  { %v451_v35 = vmax.f32 %v325_v25, %v388_v21  ;;  %v390_v36 = vld [vmem:[#allocation2 + $0x658] sm:$0xff]  ;;  %v202_v37 = vmax.f32 %v76_v32, %v139_v33  ;;  %v77_v38 = vld [vmem:[#allocation2 + $0x680] sm:$0xff]  ;;  %v140_v39 = vld [vmem:[#allocation2 + $0x688] sm:$0xff] }
  0x4c   :  { %513 = vst [vmem:[#allocation5 + $0x178] sm:$0xff] %v450_v29  ;;  %v452_v40 = vmax.f32 %v326_v30, %v389_v26  ;;  %v327_v41 = vmax.f32 %v201_v31, %v264_v28  ;;  %v391_v42 = vld [vmem:[#allocation2 + $0x678] sm:$0xff]  ;;  %v203_v43 = vmax.f32 %v77_v38, %v140_v39  ;;  %v266_v44 = vld [vmem:[#allocation2 + $0x690] sm:$0xff]  ;;  %v78_v45 = vld [vmem:[#allocation2 + $0x6a0] sm:$0xff] }
  0x4d   :  { %514 = vst [vmem:[#allocation5 + $0x180] sm:$0xff] %v451_v35  ;;  %v328_v46 = vmax.f32 %v202_v37, %v265_v34  ;;  %v392_v47 = vld [vmem:[#allocation2 + $0x698] sm:$0xff]  ;;  %v141_v48 = vld [vmem:[#allocation2 + $0x6a8] sm:$0xff]  ;;  %v267_v49 = vld [vmem:[#allocation2 + $0x6b0] sm:$0xff] }
  0x4e   :  { %515 = vst [vmem:[#allocation5 + $0x188] sm:$0xff] %v452_v40  ;;  %v453_v50 = vmax.f32 %v327_v41, %v390_v36  ;;  %v329_v51 = vmax.f32 %v203_v43, %v266_v44  ;;  %v204_v52 = vmax.f32 %v78_v45, %v141_v48  ;;  %v79_v53 = vld [vmem:[#allocation2 + $0x6c0] sm:$0xff]  ;;  %v142_v54 = vld [vmem:[#allocation2 + $0x6c8] sm:$0xff]  ;;  %v268_v55 = vld [vmem:[#allocation2 + $0x6d0] sm:$0xff] }
  0x4f   :  { %v454_v56 = vmax.f32 %v328_v46, %v391_v42  ;;  %v393_v57 = vld [vmem:[#allocation2 + $0x6b8] sm:$0xff]  ;;  %v205_v58 = vmax.f32 %v79_v53, %v142_v54  ;;  %v80_v59 = vld [vmem:[#allocation2 + $0x6e0] sm:$0xff]  ;;  %v143_v60 = vld [vmem:[#allocation2 + $0x6e8] sm:$0xff] }
  0x50   :  { %516 = vst [vmem:[#allocation5 + $0x190] sm:$0xff] %v453_v50  ;;  %v455_v61 = vmax.f32 %v329_v51, %v392_v47  ;;  %v330_v62 = vmax.f32 %v204_v52, %v267_v49  ;;  %v394_v63 = vld [vmem:[#allocation2 + $0x6d8] sm:$0xff]  ;;  %v206_v0 = vmax.f32 %v80_v59, %v143_v60  ;;  %v269_v1 = vld [vmem:[#allocation2 + $0x6f0] sm:$0xff]  ;;  %v81_v2 = vld [vmem:[#allocation2 + $0x700] sm:$0xff] }
  0x51   :  { %517 = vst [vmem:[#allocation5 + $0x198] sm:$0xff] %v454_v56  ;;  %v331_v3 = vmax.f32 %v205_v58, %v268_v55  ;;  %v395_v4 = vld [vmem:[#allocation2 + $0x6f8] sm:$0xff]  ;;  %v144_v5 = vld [vmem:[#allocation2 + $0x708] sm:$0xff]  ;;  %v270_v6 = vld [vmem:[#allocation2 + $0x710] sm:$0xff] }
  0x52   :  { %518 = vst [vmem:[#allocation5 + $0x1a0] sm:$0xff] %v455_v61  ;;  %v456_v7 = vmax.f32 %v330_v62, %v393_v57  ;;  %v332_v8 = vmax.f32 %v206_v0, %v269_v1  ;;  %v207_v9 = vmax.f32 %v81_v2, %v144_v5  ;;  %v82_v10 = vld [vmem:[#allocation2 + $0x720] sm:$0xff]  ;;  %v145_v11 = vld [vmem:[#allocation2 + $0x728] sm:$0xff]  ;;  %v271_v12 = vld [vmem:[#allocation2 + $0x730] sm:$0xff] }
  0x53   :  { %v457_v13 = vmax.f32 %v331_v3, %v394_v63  ;;  %v396_v14 = vld [vmem:[#allocation2 + $0x718] sm:$0xff]  ;;  %v208_v15 = vmax.f32 %v82_v10, %v145_v11  ;;  %v83_v16 = vld [vmem:[#allocation2 + $0x740] sm:$0xff]  ;;  %v146_v17 = vld [vmem:[#allocation2 + $0x748] sm:$0xff] }
  0x54   :  { %519 = vst [vmem:[#allocation5 + $0x1a8] sm:$0xff] %v456_v7  ;;  %v458_v18 = vmax.f32 %v332_v8, %v395_v4  ;;  %v333_v19 = vmax.f32 %v207_v9, %v270_v6  ;;  %v397_v20 = vld [vmem:[#allocation2 + $0x738] sm:$0xff]  ;;  %v209_v21 = vmax.f32 %v83_v16, %v146_v17  ;;  %v272_v22 = vld [vmem:[#allocation2 + $0x750] sm:$0xff]  ;;  %v84_v23 = vld [vmem:[#allocation2 + $0x760] sm:$0xff] }
  0x55   :  { %520 = vst [vmem:[#allocation5 + $0x1b0] sm:$0xff] %v457_v13  ;;  %v334_v24 = vmax.f32 %v208_v15, %v271_v12  ;;  %v398_v25 = vld [vmem:[#allocation2 + $0x758] sm:$0xff]  ;;  %v147_v26 = vld [vmem:[#allocation2 + $0x768] sm:$0xff]  ;;  %v273_v27 = vld [vmem:[#allocation2 + $0x770] sm:$0xff] }
  0x56   :  { %521 = vst [vmem:[#allocation5 + $0x1b8] sm:$0xff] %v458_v18  ;;  %v459_v28 = vmax.f32 %v333_v19, %v396_v14  ;;  %v335_v29 = vmax.f32 %v209_v21, %v272_v22  ;;  %v210_v30 = vmax.f32 %v84_v23, %v147_v26  ;;  %v85_v31 = vld [vmem:[#allocation2 + $0x780] sm:$0xff]  ;;  %v148_v32 = vld [vmem:[#allocation2 + $0x788] sm:$0xff]  ;;  %v274_v33 = vld [vmem:[#allocation2 + $0x790] sm:$0xff] }
  0x57   :  { %v460_v34 = vmax.f32 %v334_v24, %v397_v20  ;;  %v399_v35 = vld [vmem:[#allocation2 + $0x778] sm:$0xff]  ;;  %v211_v36 = vmax.f32 %v85_v31, %v148_v32  ;;  %v86_v37 = vld [vmem:[#allocation2 + $0x7a0] sm:$0xff]  ;;  %v149_v38 = vld [vmem:[#allocation2 + $0x7a8] sm:$0xff] }
  0x58   :  { %522 = vst [vmem:[#allocation5 + $0x1c0] sm:$0xff] %v459_v28  ;;  %v461_v39 = vmax.f32 %v335_v29, %v398_v25  ;;  %v336_v40 = vmax.f32 %v210_v30, %v273_v27  ;;  %v400_v41 = vld [vmem:[#allocation2 + $0x798] sm:$0xff]  ;;  %v212_v42 = vmax.f32 %v86_v37, %v149_v38  ;;  %v275_v43 = vld [vmem:[#allocation2 + $0x7b0] sm:$0xff]  ;;  %v87_v44 = vld [vmem:[#allocation2 + $0x7c0] sm:$0xff] }
  0x59   :  { %523 = vst [vmem:[#allocation5 + $0x1c8] sm:$0xff] %v460_v34  ;;  %v337_v45 = vmax.f32 %v211_v36, %v274_v33  ;;  %v401_v46 = vld [vmem:[#allocation2 + $0x7b8] sm:$0xff]  ;;  %v150_v47 = vld [vmem:[#allocation2 + $0x7c8] sm:$0xff]  ;;  %v276_v48 = vld [vmem:[#allocation2 + $0x7d0] sm:$0xff] }
  0x5a   :  { %524 = vst [vmem:[#allocation5 + $0x1d0] sm:$0xff] %v461_v39  ;;  %v462_v49 = vmax.f32 %v336_v40, %v399_v35  ;;  %v338_v50 = vmax.f32 %v212_v42, %v275_v43  ;;  %v213_v51 = vmax.f32 %v87_v44, %v150_v47  ;;  %v402_v53 = vld [vmem:[#allocation2 + $0x7d8] sm:$0xff] }
  0x5b   :  { %v463_v52 = vmax.f32 %v337_v45, %v400_v41 }
  0x5c   :  { %525 = vst [vmem:[#allocation5 + $0x1d8] sm:$0xff] %v462_v49  ;;  %v464_v54 = vmax.f32 %v338_v50, %v401_v46  ;;  %v339_v55 = vmax.f32 %v213_v51, %v276_v48 }
  0x5d   :  { %526 = vst [vmem:[#allocation5 + $0x1e0] sm:$0xff] %v463_v52 }
  0x5e   :  { %527 = vst [vmem:[#allocation5 + $0x1e8] sm:$0xff] %v464_v54  ;;  %v465_v56 = vmax.f32 %v339_v55, %v402_v53 }
  0x60   :  { %528 = vst [vmem:[#allocation5 + $0x1f0] sm:$0xff] %v465_v56 }
  0x61   :  { %541 = dma.vmem_to_hbm [thread:$0]  %s534_s13, 8064, %s536_s16, [#allocation4], %s610_s17, %s610_s17, %s611_s18  }
  0x62   :  { %604 = dma.done.wait [#allocation4], 8064  }
  0x63   :  { %605 = vsyncadd [#allocation4], 4294959232 }
  0x64   :  { %546 = vsyncpa [#allocation3], 1 }
  0x65   :  { %547 = vsyncpa [#allocation4], 1 }

</bundles_post_ra>
